<compile_context>
chip_gen: v6e
topology: v6e:2x2x1
jax: 0.10.0
libtpu: 0.0.40
codegen_flags: <defaults>
</compile_context>

<pallas_src>
import jax
import jax.numpy as jnp
from jax.experimental import pallas as pl
from jax.experimental.pallas import tpu as pltpu


def _cdiv(a: int, b: int) -> int:
    return -(-a // b)


def _round_up(a: int, b: int) -> int:
    return _cdiv(a, b) * b


def _sublane_multiple(dtype) -> int:
    # Packed-dtype sublane requirement: f32 -> 8, bf16/f16 -> 16, int8/fp8 -> 32.
    # TODO(synk): sub-byte dtypes (e.g. int4) need a larger multiple; fall back to 32.
    itemsize = jnp.dtype(dtype).itemsize
    return {4: 8, 2: 16, 1: 32}.get(itemsize, 32)


def _choose_lane(total: int):
    # Largest multiple of 128 (capped at 2048) that divides total exactly so the
    # 2-D view is a free metadata reshape (no pad / slice arrays materialized).
    for lane in (2048, 1024, 512, 256, 128):
        if total % lane == 0:
            return lane
    return None


def _block_budget():
    # Target block bytes + VMEM limit derived from the chip's VMEM capacity:
    #   v5e/v6e (128 MiB VMEM): limit 64 MiB, ~8 MiB blocks  -> 32 MiB buffered.
    #   v7x     ( 64 MiB VMEM): limit 32 MiB, ~5.3 MiB blocks -> ~21 MiB buffered.
    try:
        vmem_cap = int(pltpu.get_tpu_info().vmem_capacity_bytes)
    except Exception:
        vmem_cap = 64 << 20  # conservative fallback (v7x per-TC VMEM)
    vmem_limit = min(vmem_cap // 2, 64 << 20)
    # in + out, double-buffered => 4 live buffers; keep ~1/3 headroom.
    block_bytes = max(1 << 20, min(8 << 20, vmem_limit // 6))
    return block_bytes, vmem_limit


def _copy_kernel(x_ref, o_ref):
    # Identity pass-through of one lane-dense tile (full-width unmasked stores).
    o_ref[...] = x_ref[...]


def _copy_2d(x2d: jax.Array) -> jax.Array:
    """Lane-dense, tiled, software-pipelined identity copy of a 2-D slab."""
    rows, lane = x2d.shape
    itemsize = jnp.dtype(x2d.dtype).itemsize
    sub = _sublane_multiple(x2d.dtype)
    block_bytes, vmem_limit = _block_budget()
    row_bytes = lane * itemsize

    if rows <= sub:
        # Tiny input: one block equal to the full array (always a legal tiling).
        block_rows = rows
    else:
        # Constant-byte blocks (dtype-invariant), but always >=2 grid steps so
        # both v7x TensorCores get work; last block may be ragged (masked).
        n_blocks = max(2, _cdiv(rows * row_bytes, block_bytes))
        block_rows = max(sub, _round_up(_cdiv(rows, n_blocks), sub))
    grid_rows = _cdiv(rows, block_rows)

    return pl.pallas_call(
        _copy_kernel,
        out_shape=jax.ShapeDtypeStruct((rows, lane), x2d.dtype),
        grid=(grid_rows,),
        in_specs=[pl.BlockSpec((block_rows, lane), lambda i: (i, 0))],
        out_specs=pl.BlockSpec((block_rows, lane), lambda i: (i, 0)),
        compiler_params=pltpu.CompilerParams(
            dimension_semantics=("parallel",),  # independent tiles: megacore-shardable
            vmem_limit_bytes=vmem_limit,
        ),
    )(x2d)


def _run_identity(x: jax.Array) -> jax.Array:
    """Identity pass-through of x via a lane-dense Pallas copy kernel."""
    orig_shape = x.shape
    total = int(x.size)
    if total == 0:
        return x

    lane = _choose_lane(total)
    if lane is not None:
        # Hot path: free metadata reshape, no pad/slice HBM traffic.
        out2d = _copy_2d(x.reshape(total // lane, lane))
        return out2d.reshape(orig_shape)

    # Rare fallback: total not a multiple of 128 — pad to a 128-lane slab.
    lane = 128
    rows = _cdiv(total, lane)
    flat = jnp.pad(x.reshape(total), (0, rows * lane - total))
    out2d = _copy_2d(flat.reshape(rows, lane))
    return out2d.reshape(rows * lane)[:total].reshape(orig_shape)


class CoILCycleGAN:
    """JAX/Pallas port of the (empty) PyTorch CoILCycleGAN module."""

    def __init__(self, params):
        # The torch __init__ only stores params; there are no weights to create.
        self.params = params

    def forward(self, x):
        # Reference forward() has an empty body (`pass`) and returns None.
        # We do NOT launch a kernel here: its result would be discarded,
        # which is pure dead HBM traffic.
        # TODO(synk): reference forward() defines no computation to translate.
        return None


if __name__ == "__main__":
    key = jax.random.PRNGKey(0)
    # Small NCHW input consistent with a CycleGAN-style image model.
    x = jax.random.normal(key, (2, 4, 16, 16), dtype=jnp.float32)

    model = CoILCycleGAN(params={})

    # Exercise the optimized Pallas identity kernel directly and verify it.
    kernel_out = _run_identity(x)
    jax.block_until_ready(kernel_out)
    assert kernel_out.shape == x.shape and kernel_out.dtype == x.dtype
    assert bool(jnp.array_equal(kernel_out, x))

    # bf16 path (exercises the 16-row sublane multiple + dtype-scaled blocks).
    x_bf16 = x.astype(jnp.bfloat16)
    out_bf16 = _run_identity(x_bf16)
    jax.block_until_ready(out_bf16)
    assert out_bf16.shape == x_bf16.shape and out_bf16.dtype == jnp.bfloat16
    assert bool(jnp.array_equal(out_bf16, x_bf16))

    # Mid-size input: exercises the >=2-step parallel grid + ragged last block.
    x_mid = jax.random.normal(jax.random.PRNGKey(1), (2, 3, 64, 64), dtype=jnp.float32)
    out_mid = _run_identity(x_mid)
    jax.block_until_ready(out_mid)
    assert bool(jnp.array_equal(out_mid, x_mid))

    # Ragged total (not a multiple of 128): exercises the pad/slice fallback.
    x_rag = jax.random.normal(jax.random.PRNGKey(2), (3, 5, 7), dtype=jnp.float32)
    out_rag = _run_identity(x_rag)
    jax.block_until_ready(out_rag)
    assert bool(jnp.array_equal(out_rag, x_rag))

    # Module forward matches PyTorch semantics exactly: returns None.
    result = model.forward(x)
    assert result is None

    print("KERNEL_OK")
</pallas_src>

<mosaic_0001>
module attributes {stable_mosaic.version = 11 : i64} {
  func.func @_copy_kernel(%arg0: i32, %arg1: memref<1x2048xf32, #tpu.memory_space<vmem>>, %arg2: memref<1x2048xf32, #tpu.memory_space<vmem>>) attributes {dimension_semantics = [#tpu.dimension_semantics<parallel>], iteration_bounds = array<i64: 1>, scalar_prefetch = 0 : i64, scratch_operands = 0 : i64, tpu.core_type = #tpu.core_type<tc>, window_params = [{transform_indices = @transform_0, window_bounds = array<i64: 1, 2048>}, {transform_indices = @transform_1, window_bounds = array<i64: 1, 2048>}]} {
    %c0 = arith.constant 0 : index
    %c0_0 = arith.constant 0 : index
    %0 = vector.load %arg1[%c0, %c0_0] : memref<1x2048xf32, #tpu.memory_space<vmem>>, vector<1x2048xf32>
    %c0_1 = arith.constant 0 : index
    %c0_2 = arith.constant 0 : index
    %1 = vector.load %arg2[%c0_1, %c0_2] : memref<1x2048xf32, #tpu.memory_space<vmem>>, vector<1x2048xf32>
    tpu.vector_store %arg2[%c0_1, %c0_2], %0 {strides = array<i32>} : memref<1x2048xf32, #tpu.memory_space<vmem>>, vector<1x2048xf32>,
    return
  }
  func.func @transform_0(%arg0: i32) -> (i32, i32) {
    %c0_i32 = arith.constant 0 : i32
    %c0_i32_0 = arith.constant 0 : i32
    return %arg0, %c0_i32 : i32, i32
  }
  func.func @transform_1(%arg0: i32) -> (i32, i32) {
    %c0_i32 = arith.constant 0 : i32
    %c0_i32_0 = arith.constant 0 : i32
    return %arg0, %c0_i32 : i32, i32
  }
}

</mosaic_0001>

<bundles_post_ra>
// kernel: tpu_custom_call.1
= control target key start
LH: loop header
LB: loop body
LE: loop exit
PB: predicated region body
PF: predicated region fallthrough
CT: control target
= control target key end

     0   :  { %6 = vsyncpa [#allocation3], 0  ;;  %s104_s0 = inlined_call_operand.hbm [shape: f32[1,2048], index: 0, kind: input, shape index: {}]   ;;  %s105_s1 = inlined_call_operand.hbm [shape: f32[1,2048], index: 1, kind: output, shape index: {}]  }
   0x1   :  { %7 = vsyncpa [#allocation4], 0  ;;  %s86_s6 = smov [#allocation2]  }
   0x2   :  { %s14_s7 = sshll.u32 %s86_s6, 4  ;;  %s15_s7 = int_to_ptr.vmem [resolvable:$true] %s14_s7 }
   0x3   :  { %s50_s8 = scalar_lea.vmem %s15_s7, 256  ;;  %p55_p1 = scmp.lt.s32.totalorder %s15_s7, %s15_s7 }
   0x4   :  { %p51_p0 = scmp.ne.s32.totalorder %s15_s7, %s50_s8  ;;  %p56_p2 = scmp.lt.s32.totalorder %s50_s8, %s50_s8 }
   0x6   :  { %p57_p3 = por %p56_p2, %p55_p1 }
   0x8   :  { %p58_p4 = pnand %p57_p3, %p51_p0 }
   0xa   :  { %61 = shalt.err (!%p58_p4)
}
   0xb   :  { %17 = dma.hbm_to_vmem [thread:$0]  %s104_s0, 256, %s15_s7, [#allocation3]  }
   0xc   :  { %82 = dma.done.wait [#allocation3], 256  }
   0xd   :  { %83 = vsyncadd [#allocation3], 4294967040  ;;  %s87_s11 = smov [#allocation5]   ;;  %v21_v0 = vld [vmem:[#allocation2] sm:$0xff]  ;;  %v22_v1 = vld [vmem:[#allocation2 + $0x8] sm:$0xff] }
   0xe   :  { %s31_s12 = sshll.u32 %s87_s11, 4  ;;  %23 = vst [vmem:[#allocation5] sm:$0xff] %v21_v0  ;;  %24 = vst [vmem:[#allocation5 + $0x8] sm:$0xff] %v22_v1  ;;  %s32_s12 = int_to_ptr.vmem [resolvable:$true] %s31_s12 }
   0xf   :  { %s62_s13 = scalar_lea.vmem %s32_s12, 256  ;;  %p67_p6 = scmp.lt.s32.totalorder %s32_s12, %s32_s12 }
  0x10   :  { %p63_p5 = scmp.ne.s32.totalorder %s32_s12, %s62_s13  ;;  %p68_p7 = scmp.lt.s32.totalorder %s62_s13, %s62_s13 }
  0x12   :  { %p69_p8 = por %p68_p7, %p67_p6 }
  0x14   :  { %p70_p9 = pnand %p69_p8, %p63_p5 }
  0x16   :  { %73 = shalt.err (!%p70_p9)
}
  0x17   :  { %34 = dma.vmem_to_hbm [thread:$0]  %s32_s12, 256, %s105_s1, [#allocation4]  }
  0x18   :  { %84 = dma.done.wait [#allocation4], 256  }
  0x19   :  { %85 = vsyncadd [#allocation4], 4294967040 }
  0x1a   :  { %38 = vsyncpa [#allocation3], 1 }
  0x1b   :  { %39 = vsyncpa [#allocation4], 1 }

</bundles_post_ra>
